<compile_context>
chip_gen: v5e
topology: v5e:2x2
jax: 0.10.0
libtpu: 0.0.40
codegen_flags: <defaults>
</compile_context>

<pallas_src>
import math

import jax
import jax.numpy as jnp
from jax.experimental import pallas as pl
from jax.experimental.pallas import tpu as pltpu


def critic_kernel(s_ref, a_ref, w1s_ref, w1a_ref, b1_ref, w2_ref, b2_ref,
                  w3_ref, b3_ref, o_ref):
    # linear1 over the (virtual) concat, transposed: h1 = W1s^T s^T + W1a^T a^T
    h1 = jnp.dot(w1s_ref[...], s_ref[...], preferred_element_type=jnp.float32)
    h1 = h1 + jnp.dot(w1a_ref[...], a_ref[...],
                      preferred_element_type=jnp.float32)
    h1 = jnp.maximum(h1 + b1_ref[...], 0.0)                      # [H, TB] f32

    # linear2 + relu (activations cast back to the weight dtype for the MXU)
    h2 = jnp.dot(w2_ref[...], h1.astype(w2_ref.dtype),
                 preferred_element_type=jnp.float32)
    h2 = jnp.maximum(h2 + b2_ref[...], 0.0)                      # [H, TB] f32

    # linear3 (out_features == 1): VPU multiply + sublane reduction gives a
    # lane-dense [1, TB] row; b3 is a scalar read from SMEM.
    q = jnp.sum(h2 * w3_ref[...], axis=0, keepdims=True) + b3_ref[0, 0]
    o_ref[...] = q.astype(o_ref.dtype)                           # [1, TB]


def _round_up(n, m):
    return ((n + m - 1) // m) * m


def critic_forward(state, action, params, *, compute_dtype=jnp.bfloat16,
                   tile_b=None):
    """state: [B, state_dim], action: [B, action_dim] -> q: [B, 1] (float32)."""
    w1, b1, w2, b2, w3, b3 = params
    B, state_dim = state.shape
    action_dim = action.shape[1]
    hidden_dim = w2.shape[0]

    if compute_dtype is None:
        compute_dtype = jnp.float32

    # Transposed ("batch in lanes") operands; weight transposes are one-time,
    # trace-level ops on small arrays.  linear1's weight is split so no HBM
    # concat of state/action is ever materialized.
    s_t = state.T.astype(compute_dtype)                  # [S, B]
    a_t = action.T.astype(compute_dtype)                 # [A, B]
    w1s_t = w1[:state_dim].T.astype(compute_dtype)       # [H, S]
    w1a_t = w1[state_dim:].T.astype(compute_dtype)       # [H, A]
    w2_t = w2.T.astype(compute_dtype)                    # [H, H]
    b1_c = b1.reshape(hidden_dim, 1).astype(jnp.float32)
    b2_c = b2.reshape(hidden_dim, 1).astype(jnp.float32)
    w3_c = w3.reshape(hidden_dim, 1).astype(jnp.float32)
    b3_s = b3.reshape(1, 1).astype(jnp.float32)

    in_isz = jnp.dtype(compute_dtype).itemsize
    w_isz = in_isz

    def pad8(n):
        return _round_up(n, 8)

    def pad128(n):
        return _round_up(n, 128)

    def vmem_need(tb):
        # streamed input tiles (double-buffered) + output row (double-buffered)
        stream = 2 * (pad8(state_dim) + pad8(action_dim)) * tb * in_isz
        stream += 2 * 8 * tb * 4
        # VMEM-resident weights/biases (double-buffered by the auto pipeline)
        resident = 2 * pad8(hidden_dim) * (pad128(state_dim)
                                           + pad128(action_dim)
                                           + pad128(hidden_dim)) * w_isz
        resident += 2 * 3 * pad8(hidden_dim) * 128 * 4           # b1, b2, w3
        # live activations: h1/h2 in f32 + bf16 cast copy
        acts = 3 * pad8(hidden_dim) * tb * 4
        return stream + resident + acts

    budget = 48 * 1024 * 1024   # leaves headroom even on v7x's 64 MiB VMEM
    if tile_b is None:
        # Big tiles amortize per-grid-step overhead; keep >= 2 steps when the
        # batch allows so both v7x TensorCores get work.
        tile_b = max(128, min(8192, _round_up(pl.cdiv(B, 2), 128)))
    else:
        tile_b = max(128, _round_up(tile_b, 128))
    while vmem_need(tile_b) > budget and tile_b > 256:
        tile_b //= 2

    grid = (pl.cdiv(B, tile_b),)   # ragged last block handled by Pallas (no pad)
    vmem_limit = int(min(max(2 * vmem_need(tile_b), 16 * 1024 * 1024), budget))

    col_map = lambda i: (0, i)     # batch-tiled (lane-axis) arrays
    rep_map = lambda i: (0, 0)     # VMEM-resident params (same block every step)

    in_specs = [
        pl.BlockSpec((state_dim, tile_b), col_map),
        pl.BlockSpec((action_dim, tile_b), col_map),
        pl.BlockSpec(w1s_t.shape, rep_map),
        pl.BlockSpec(w1a_t.shape, rep_map),
        pl.BlockSpec(b1_c.shape, rep_map),
        pl.BlockSpec(w2_t.shape, rep_map),
        pl.BlockSpec(b2_c.shape, rep_map),
        pl.BlockSpec(w3_c.shape, rep_map),
        pl.BlockSpec(memory_space=pltpu.MemorySpace.SMEM),       # b3 scalar
    ]
    out_specs = pl.BlockSpec((1, tile_b), col_map)

    flops = 2 * B * ((state_dim + action_dim) * hidden_dim
                     + hidden_dim * hidden_dim + hidden_dim)
    bytes_accessed = (B * (state_dim + action_dim) * in_isz
                      + ((state_dim + action_dim) * hidden_dim
                         + hidden_dim * hidden_dim) * w_isz
                      + (3 * hidden_dim + 1) * 4
                      + B * 4)

    q_row = pl.pallas_call(
        critic_kernel,
        out_shape=jax.ShapeDtypeStruct((1, B), jnp.float32),
        grid=grid,
        in_specs=in_specs,
        out_specs=out_specs,
        compiler_params=pltpu.CompilerParams(
            dimension_semantics=("parallel",),
            vmem_limit_bytes=vmem_limit,
        ),
        cost_estimate=pl.CostEstimate(flops=flops, transcendentals=0,
                                      bytes_accessed=bytes_accessed),
    )(s_t, a_t, w1s_t, w1a_t, b1_c, w2_t, b2_c, w3_c, b3_s)
    return q_row.reshape(B, 1)


def init_critic_params(key, state_dim, action_dim, hidden_dim, init_w=0.003):
    """Mirrors nn.Linear default init + the uniform(-init_w, init_w) override
    on linear3. Weights stored [in, out] (transposed vs torch's [out, in])."""
    k1, k2, k3, k4, k5, k6 = jax.random.split(key, 6)
    in1 = state_dim + action_dim

    def u(k, shape, bound):
        return jax.random.uniform(k, shape, jnp.float32, -bound, bound)

    bound1 = 1.0 / math.sqrt(in1)
    bound2 = 1.0 / math.sqrt(hidden_dim)

    w1 = u(k1, (in1, hidden_dim), bound1)
    b1 = u(k2, (1, hidden_dim), bound1)
    w2 = u(k3, (hidden_dim, hidden_dim), bound2)
    b2 = u(k4, (1, hidden_dim), bound2)
    w3 = u(k5, (hidden_dim, 1), init_w)
    b3 = u(k6, (1, 1), init_w)
    return (w1, b1, w2, b2, w3, b3)


if __name__ == "__main__":
    state_dim, action_dim, hidden_dim, batch = 12, 4, 32, 2

    key = jax.random.PRNGKey(0)
    kp, ks, ka = jax.random.split(key, 3)

    params = init_critic_params(kp, state_dim, action_dim, hidden_dim)
    state = jax.random.normal(ks, (batch, state_dim), jnp.float32)
    action = jax.random.normal(ka, (batch, action_dim), jnp.float32)

    def reference(s, a, p):
        w1, b1, w2, b2, w3, b3 = p
        x = jnp.concatenate([s, a], axis=1)
        h = jnp.maximum(x @ w1 + b1, 0.0)
        h = jnp.maximum(h @ w2 + b2, 0.0)
        return h @ w3 + b3

    ref = reference(state, action, params)

    # exact f32 path (single grid step, ragged lane edge, lane-dense store)
    q32 = critic_forward(state, action, params, compute_dtype=jnp.float32)
    jax.block_until_ready(q32)
    assert q32.shape == (batch, 1)
    assert jnp.allclose(q32, ref, atol=1e-5), "f32 mismatch vs reference"

    # default bf16-streaming path (f32 accumulation / elementwise)
    qbf = critic_forward(state, action, params)
    jax.block_until_ready(qbf)
    assert qbf.shape == (batch, 1)
    assert jnp.allclose(qbf, ref, atol=2e-2, rtol=2e-2), "bf16 mismatch"

    # multi-tile path: grid > 1 with a ragged last block (no jnp.pad copies)
    ks2, ka2 = jax.random.split(jax.random.PRNGKey(1))
    big_b = 300
    state2 = jax.random.normal(ks2, (big_b, state_dim), jnp.float32)
    action2 = jax.random.normal(ka2, (big_b, action_dim), jnp.float32)
    q2 = critic_forward(state2, action2, params, compute_dtype=jnp.float32,
                        tile_b=128)
    jax.block_until_ready(q2)
    ref2 = reference(state2, action2, params)
    assert q2.shape == (big_b, 1)
    assert jnp.allclose(q2, ref2, atol=1e-5), "tiled f32 mismatch vs reference"

    print("KERNEL_OK")
</pallas_src>

<mosaic_0001>
module attributes {stable_mosaic.version = 11 : i64} {
  func.func @critic_kernel(%arg0: i32, %arg1: memref<12x128xf32, #tpu.memory_space<vmem>>, %arg2: memref<4x128xf32, #tpu.memory_space<vmem>>, %arg3: memref<32x12xf32, #tpu.memory_space<vmem>>, %arg4: memref<32x4xf32, #tpu.memory_space<vmem>>, %arg5: memref<32x1xf32, #tpu.memory_space<vmem>>, %arg6: memref<32x32xf32, #tpu.memory_space<vmem>>, %arg7: memref<32x1xf32, #tpu.memory_space<vmem>>, %arg8: memref<32x1xf32, #tpu.memory_space<vmem>>, %arg9: memref<1x1xf32, #tpu.memory_space<smem>>, %arg10: memref<1x128xf32, #tpu.memory_space<vmem>>) attributes {dimension_semantics = [#tpu.dimension_semantics<parallel>], iteration_bounds = array<i64: 1>, scalar_prefetch = 0 : i64, scratch_operands = 0 : i64, tpu.core_type = #tpu.core_type<tc>, window_params = [{transform_indices = @transform_0, window_bounds = array<i64: 12, 128>}, {transform_indices = @transform_1, window_bounds = array<i64: 4, 128>}, {pipeline_mode = #tpu.pipeline_mode<synchronous>, transform_indices = @transform_2, window_bounds = array<i64: 32, 12>}, {pipeline_mode = #tpu.pipeline_mode<synchronous>, transform_indices = @transform_3, window_bounds = array<i64: 32, 4>}, {pipeline_mode = #tpu.pipeline_mode<synchronous>, transform_indices = @transform_4, window_bounds = array<i64: 32, 1>}, {pipeline_mode = #tpu.pipeline_mode<synchronous>, transform_indices = @transform_5, window_bounds = array<i64: 32, 32>}, {pipeline_mode = #tpu.pipeline_mode<synchronous>, transform_indices = @transform_6, window_bounds = array<i64: 32, 1>}, {pipeline_mode = #tpu.pipeline_mode<synchronous>, transform_indices = @transform_7, window_bounds = array<i64: 32, 1>}, {transform_indices = @transform_8, window_bounds = array<i64: 1, 1>}, {transform_indices = @transform_9, window_bounds = array<i64: 1, 128>}]} {
    %c0 = arith.constant 0 : index
    %c0_0 = arith.constant 0 : index
    %0 = vector.load %arg3[%c0, %c0_0] : memref<32x12xf32, #tpu.memory_space<vmem>>, vector<32x12xf32>
    %c0_1 = arith.constant 0 : index
    %c0_2 = arith.constant 0 : index
    %1 = vector.load %arg1[%c0_1, %c0_2] : memref<12x128xf32, #tpu.memory_space<vmem>>, vector<12x128xf32>
    %cst = arith.constant dense<0.000000e+00> : vector<32x128xf32>
    %2 = tpu.matmul %0, %1, %cst {dimension_numbers = #tpu.dot_dimension_numbers<[1], [0], [0], [1], [0, 0, 1, 1], [], []>} : vector<32x12xf32>, vector<12x128xf32>, vector<32x128xf32> -> vector<32x128xf32>
    %c0_3 = arith.constant 0 : index
    %c0_4 = arith.constant 0 : index
    %3 = vector.load %arg4[%c0_3, %c0_4] : memref<32x4xf32, #tpu.memory_space<vmem>>, vector<32x4xf32>
    %c0_5 = arith.constant 0 : index
    %c0_6 = arith.constant 0 : index
    %4 = vector.load %arg2[%c0_5, %c0_6] : memref<4x128xf32, #tpu.memory_space<vmem>>, vector<4x128xf32>
    %cst_7 = arith.constant dense<0.000000e+00> : vector<32x128xf32>
    %5 = tpu.matmul %3, %4, %cst_7 {dimension_numbers = #tpu.dot_dimension_numbers<[1], [0], [0], [1], [0, 0, 1, 1], [], []>} : vector<32x4xf32>, vector<4x128xf32>, vector<32x128xf32> -> vector<32x128xf32>
    %6 = arith.addf %2, %5 : vector<32x128xf32>
    %c0_8 = arith.constant 0 : index
    %c0_9 = arith.constant 0 : index
    %7 = vector.load %arg5[%c0_8, %c0_9] : memref<32x1xf32, #tpu.memory_space<vmem>>, vector<32x1xf32>
    %8 = vector.broadcast %7 : vector<32x1xf32> to vector<32x128xf32>
    %9 = arith.addf %6, %8 : vector<32x128xf32>
    %cst_10 = arith.constant 0.000000e+00 : f32
    %10 = vector.broadcast %cst_10 : f32 to vector<32x128xf32>
    %11 = arith.maximumf %9, %10 : vector<32x128xf32>
    %c0_11 = arith.constant 0 : index
    %c0_12 = arith.constant 0 : index
    %12 = vector.load %arg6[%c0_11, %c0_12] : memref<32x32xf32, #tpu.memory_space<vmem>>, vector<32x32xf32>
    %cst_13 = arith.constant dense<0.000000e+00> : vector<32x128xf32>
    %13 = tpu.matmul %12, %11, %cst_13 {dimension_numbers = #tpu.dot_dimension_numbers<[1], [0], [0], [1], [0, 0, 1, 1], [], []>} : vector<32x32xf32>, vector<32x128xf32>, vector<32x128xf32> -> vector<32x128xf32>
    %c0_14 = arith.constant 0 : index
    %c0_15 = arith.constant 0 : index
    %14 = vector.load %arg7[%c0_14, %c0_15] : memref<32x1xf32, #tpu.memory_space<vmem>>, vector<32x1xf32>
    %15 = vector.broadcast %14 : vector<32x1xf32> to vector<32x128xf32>
    %16 = arith.addf %13, %15 : vector<32x128xf32>
    %cst_16 = arith.constant 0.000000e+00 : f32
    %17 = vector.broadcast %cst_16 : f32 to vector<32x128xf32>
    %18 = arith.maximumf %16, %17 : vector<32x128xf32>
    %c0_17 = arith.constant 0 : index
    %c0_18 = arith.constant 0 : index
    %19 = vector.load %arg8[%c0_17, %c0_18] : memref<32x1xf32, #tpu.memory_space<vmem>>, vector<32x1xf32>
    %20 = vector.broadcast %19 : vector<32x1xf32> to vector<32x128xf32>
    %21 = arith.mulf %18, %20 : vector<32x128xf32>
    %cst_19 = arith.constant dense<0.000000e+00> : vector<128xf32>
    %22 = vector.multi_reduction <add>, %21, %cst_19 [0] : vector<32x128xf32> to vector<128xf32>
    %23 = vector.shape_cast %22 : vector<128xf32> to vector<1x128xf32>
    %c0_20 = arith.constant 0 : index
    %c0_21 = arith.constant 0 : index
    %24 = memref.load %arg9[%c0_20, %c0_21] : memref<1x1xf32, #tpu.memory_space<smem>>
    %25 = vector.broadcast %24 : f32 to vector<1x128xf32>
    %26 = arith.addf %23, %25 : vector<1x128xf32>
    %c0_22 = arith.constant 0 : index
    %c0_23 = arith.constant 0 : index
    %27 = vector.load %arg10[%c0_22, %c0_23] : memref<1x128xf32, #tpu.memory_space<vmem>>, vector<1x128xf32>
    tpu.vector_store %arg10[%c0_22, %c0_23], %26 {strides = array<i32>} : memref<1x128xf32, #tpu.memory_space<vmem>>, vector<1x128xf32>,
    return
  }
  func.func @transform_0(%arg0: i32) -> (i32, i32) {
    %c0_i32 = arith.constant 0 : i32
    %c0_i32_0 = arith.constant 0 : i32
    return %c0_i32, %arg0 : i32, i32
  }
  func.func @transform_1(%arg0: i32) -> (i32, i32) {
    %c0_i32 = arith.constant 0 : i32
    %c0_i32_0 = arith.constant 0 : i32
    return %c0_i32, %arg0 : i32, i32
  }
  func.func @transform_2(%arg0: i32) -> (i32, i32) {
    %c0_i32 = arith.constant 0 : i32
    %c0_i32_0 = arith.constant 0 : i32
    %c0_i32_1 = arith.constant 0 : i32
    return %c0_i32, %c0_i32_0 : i32, i32
  }
  func.func @transform_3(%arg0: i32) -> (i32, i32) {
    %c0_i32 = arith.constant 0 : i32
    %c0_i32_0 = arith.constant 0 : i32
    %c0_i32_1 = arith.constant 0 : i32
    return %c0_i32, %c0_i32_0 : i32, i32
  }
  func.func @transform_4(%arg0: i32) -> (i32, i32) {
    %c0_i32 = arith.constant 0 : i32
    %c0_i32_0 = arith.constant 0 : i32
    %c0_i32_1 = arith.constant 0 : i32
    return %c0_i32, %c0_i32_0 : i32, i32
  }
  func.func @transform_5(%arg0: i32) -> (i32, i32) {
    %c0_i32 = arith.constant 0 : i32
    %c0_i32_0 = arith.constant 0 : i32
    %c0_i32_1 = arith.constant 0 : i32
    return %c0_i32, %c0_i32_0 : i32, i32
  }
  func.func @transform_6(%arg0: i32) -> (i32, i32) {
    %c0_i32 = arith.constant 0 : i32
    %c0_i32_0 = arith.constant 0 : i32
    %c0_i32_1 = arith.constant 0 : i32
    return %c0_i32, %c0_i32_0 : i32, i32
  }
  func.func @transform_7(%arg0: i32) -> (i32, i32) {
    %c0_i32 = arith.constant 0 : i32
    %c0_i32_0 = arith.constant 0 : i32
    %c0_i32_1 = arith.constant 0 : i32
    return %c0_i32, %c0_i32_0 : i32, i32
  }
  func.func @transform_8(%arg0: i32) -> (i32, i32) {
    %c0_i32 = arith.constant 0 : i32
    %c0_i32_0 = arith.constant 0 : i32
    %c0_i32_1 = arith.constant 0 : i32
    return %c0_i32, %c0_i32_0 : i32, i32
  }
  func.func @transform_9(%arg0: i32) -> (i32, i32) {
    %c0_i32 = arith.constant 0 : i32
    %c0_i32_0 = arith.constant 0 : i32
    return %c0_i32, %arg0 : i32, i32
  }
}

</mosaic_0001>

<bundles_post_ra>
// kernel: tpu_custom_call.1
= control target key start
LH: loop header
LB: loop body
LE: loop exit
PB: predicated region body
PF: predicated region fallthrough
CT: control target
= control target key end

     0   :  { %vm58_vm0 = vcmask 1043456   ;;  %vm45_vm1 = vcmask 31744   ;;  %vm91_vm2 = vcmask 97280   ;;  %v350_v6 = vmov 0   ;;  %s500_s0 = inlined_call_operand.vmem [shape: f32[12,2], index: 0, kind: input, shape index: {}]   ;;  %s501_s1 = inlined_call_operand.vmem [shape: f32[4,2], index: 1, kind: input, shape index: {}]   ;;  %s502_s2 = inlined_call_operand.vmem [shape: f32[32,12], index: 2, kind: input, shape index: {}]   ;;  %s503_s3 = inlined_call_operand.vmem [shape: f32[32,4], index: 3, kind: input, shape index: {}]   ;;  %s504_s4 = inlined_call_operand.vmem [shape: f32[32,1], index: 4, kind: input, shape index: {}]   ;;  %s505_s5 = inlined_call_operand.vmem [shape: f32[32,32], index: 5, kind: input, shape index: {}]   ;;  %s506_s6 = inlined_call_operand.vmem [shape: f32[32,1], index: 6, kind: input, shape index: {}]   ;;  %s507_s7 = inlined_call_operand.vmem [shape: f32[32,1], index: 7, kind: input, shape index: {}]   ;;  %s508_s8 = inlined_call_operand.<no memory space> [shape: f32[1,1], index: 8, kind: input, shape index: {}]   ;;  %s509_s9 = inlined_call_operand.hbm [shape: f32[1,2], index: 9, kind: output, shape index: {}]  }
   0x1   :  { %v44_v0 = vld [vmem:[%s501_s1] sm:$0xf]  ;;  %v39_v1 = vld [vmem:[%s500_s0 + $0x8] sm:$0xf]  ;;  %v139_v5 = vld [vmem:[%s504_s4 + $0x18] sm:$0xff]  ;;  %322 = vset.pattern.permute.xlu1 %v350_v6  ;;  %321 = vset.pattern.permute.xlu0 %v350_v6 }
   0x2   :  { %v40_v2 = vld [vmem:[%s503_s3] sm:$0xff]  ;;  %299 = vmatpush.msk.msra.mxu0 %vm58_vm0, %v44_v0  ;;  %304 = vmatpush.msk.msra.mxu1 %vm58_vm0, %v39_v1  ;;  %v137_v7 = vld [vmem:[%s504_s4 + $0x8] sm:$0xff]  ;;  %v37_v8 = vld [vmem:[%s502_s2 + $0x18] sm:$0xff] }
   0x3   :  { %v38_v3 = vld [vmem:[%s500_s0] sm:$0xff]  ;;  %300 = vmatmul.msk.f32.vlgmr.msra.gmra.mxu0 %vm45_vm1, %v40_v2  ;;  %157 = vperm.xlu0 %321, %v139_v5  }
   0x4   :  { %v34_v4 = vld [vmem:[%s502_s2] sm:$0xff]  ;;  %122 = vmatpush.msra.mxu1 %v38_v3  ;;  %147 = vperm.xlu1 %322, %v137_v7  }
   0x5   :  { %305 = vmatmul.msk.f32.vlgmr.msra.gmra.mxu1 %vm91_vm2, %v34_v4  ;;  %313 = vmatpush.msk.msra.mxu2 %vm58_vm0, %v39_v1 }
   0x6   :  { %323 = vset.pattern.permute.xlu2 %v350_v6 }
   0x7   :  { %15 = vsyncpa [#allocation4], 0  ;;  %v41_v9 = vld [vmem:[%s503_s3 + $0x8] sm:$0xff]  ;;  %314 = vmatpush.msra.mxu2 %v38_v3  ;;  %v138_v11 = vld [vmem:[%s504_s4 + $0x10] sm:$0xff]  ;;  %vm196_vm3 = vcmask 261120   ;;  %s351_s13 = smov [#allocation3]  }
   0x8   :  { %308 = vmatmul.msk.f32.vlgmr.msra.gmra.mxu2 %vm91_vm2, %v37_v8  ;;  %v35_v10 = vld [vmem:[%s502_s2 + $0x8] sm:$0xff]  ;;  %v136_v12 = vld [vmem:[%s504_s4] sm:$0xff]  ;;  %v42_v13 = vld [vmem:[%s503_s3 + $0x10] sm:$0xff]  ;;  %s288_s14 = sshll.u32 %s351_s13, 4  ;;  %s290_s4 = sshll.u32 %s509_s9, 4  ;;  %s289_s14 = int_to_ptr.vmem [resolvable:$true] %s288_s14  ;;  %s291_s4 = int_to_ptr.hbm [resolvable:$true] %s290_s4 }
   0x9   :  { %v36_v14 = vld [vmem:[%s502_s2 + $0x10] sm:$0xff]  ;;  %v175_v16 = vld [vmem:[%s506_s6 + $0x18] sm:$0xff]  ;;  %v243_v18 = vld [vmem:[%s507_s7 + $0x8] sm:$0xff] }
   0xa   :  { %v174_v15 = vld [vmem:[%s506_s6 + $0x10] sm:$0xff]  ;;  %v43_v17 = vld [vmem:[%s503_s3 + $0x18] sm:$0xff]  ;;  %v172_v24 = vld [vmem:[%s506_s6] sm:$0xff] }
   0xb   :  { %301 = vmatmul.msk.f32.gmra.mxu0 %vm45_vm1, %v41_v9  ;;  %152 = vperm.xlu0 %321, %v138_v11   ;;  %v244_v19 = vld [vmem:[%s507_s7 + $0x10] sm:$0xff]  ;;  %v173_v30 = vld [vmem:[%s506_s6 + $0x8] sm:$0xff]  ;;  %v242_v42 = vld [vmem:[%s507_s7] sm:$0xff] }
   0xc   :  { %142 = vperm.xlu1 %322, %v136_v12   ;;  %178 = vperm.xlu2 %323, %v172_v24   ;;  %v168_v47 = vld [vmem:[%s505_s5] sm:$0xff]  ;;  %v169_v48 = vld [vmem:[%s505_s5 + $0x8] sm:$0xff]  ;;  %v245_v49 = vld [vmem:[%s507_s7 + $0x18] sm:$0xff] }
   0xd   :  { %306 = vmatmul.msk.f32.gmra.mxu1 %vm91_vm2, %v35_v10  ;;  %v170_v50 = vld [vmem:[%s505_s5 + $0x10] sm:$0xff]  ;;  %v171_v51 = vld [vmem:[%s505_s5 + $0x18] sm:$0xff] }
  0x13   :  { %302 = vmatmul.msk.f32.gmra.mxu0 %vm45_vm1, %v42_v13  ;;  %188 = vperm.xlu0 %321, %v174_v15  }
  0x14   :  { %193 = vperm.xlu1 %322, %v175_v16   ;;  %183 = vperm.xlu2 %323, %v173_v30  }
  0x15   :  { %307 = vmatmul.msk.f32.gmra.mxu1 %vm91_vm2, %v36_v14 }
  0x1b   :  { %303 = vmatmul.msk.f32.gmra.mxu0 %vm45_vm1, %v43_v17  ;;  %253 = vperm.xlu0 %321, %v243_v18  }
  0x1c   :  { %258 = vperm.xlu1 %322, %v244_v19   ;;  %248 = vperm.xlu2 %323, %v242_v42  }
  0x24   :  { %263 = vperm.xlu2 %323, %v245_v49  }
  0x66   :  { %v179_v52 = vpop.permute.xlu2 %178 }
  0x6e   :  { %v184_v53 = vpop.permute.xlu2 %183 }
  0x75   :  { %v158_v25 = vpop.permute.xlu0 %157 }
  0x76   :  { %v148_v27 = vpop.permute.xlu1 %147  ;;  %v249_v62 = vpop.permute.xlu2 %248 }
  0x7d   :  { %v153_v35 = vpop.permute.xlu0 %152 }
  0x7e   :  { %v143_v39 = vpop.permute.xlu1 %142  ;;  %v264_v11 = vpop.permute.xlu2 %263 }
  0x80   :  { %v79_v20 = vpop.f32.mrf.mxu0 }
  0x82   :  { %v124_v21 = vpop.f32.mrf.mxu1 }
  0x83   :  { %v125_v36 = vadd.f32 %v124_v21, %v79_v20  ;;  %v280_v20 = vstv %s508_s8 }
  0x85   :  { %v160_v43 = vadd.f32 %v143_v39, %v125_v36  ;;  %v189_v55 = vpop.permute.xlu0 %188 }
  0x86   :  { %v194_v57 = vpop.permute.xlu1 %193 }
  0x87   :  { %v164_v46 = vmax.f32 %v160_v43, 0.0 }
  0x88   :  { %v82_v22 = vpop.f32.mrf.mxu0 }
  0x8a   :  { %v127_v23 = vpop.f32.mrf.mxu1 }
  0x8b   :  { %v133_v29 = vpop.f32.mrf.mxu2  ;;  %v128_v33 = vadd.f32 %v127_v23, %v82_v22 }
  0x8d   :  { %v161_v41 = vadd.f32 %v148_v27, %v128_v33  ;;  %v254_v2 = vpop.permute.xlu0 %253 }
  0x8e   :  { %v259_v5 = vpop.permute.xlu1 %258 }
  0x8f   :  { %v165_v45 = vmax.f32 %v161_v41, 0.0 }
  0x90   :  { %v85_v26 = vpop.f32.mrf.mxu0 }
  0x92   :  { %v130_v28 = vpop.f32.mrf.mxu1 }
  0x93   :  { %v131_v31 = vadd.f32 %v130_v28, %v85_v26 }
  0x95   :  { %v162_v38 = vadd.f32 %v153_v35, %v131_v31 }
  0x97   :  { %v166_v44 = vmax.f32 %v162_v38, 0.0 }
  0x98   :  { %v88_v32 = vpop.f32.mrf.mxu0 }
  0x99   :  { %v134_v34 = vadd.f32 %v133_v29, %v88_v32 }
  0x9b   :  { %v163_v37 = vadd.f32 %v158_v25, %v134_v34 }
  0x9d   :  { %v167_v40 = vmax.f32 %v163_v37, 0.0 }
  0x9f   :  { %221 = vmatpush.msrb.mxu2 %v167_v40  ;;  %315 = vmatpush.msra.mxu3 %v167_v40 }
  0xa1   :  { %222 = vmatpush.msrb.mxu2 %v166_v44  ;;  %316 = vmatpush.msra.mxu3 %v166_v44 }
  0xa3   :  { %223 = vmatpush.msrb.mxu2 %v165_v45  ;;  %317 = vmatpush.msra.mxu3 %v165_v45 }
  0xa5   :  { %224 = vmatpush.msrb.mxu2 %v164_v46  ;;  %318 = vmatpush.msra.mxu3 %v164_v46 }
  0xa6   :  { %309 = vmatmul.msk.f32.vlgmr.msrb.gmra.mxu2 %vm196_vm3, %v168_v47  ;;  %310 = vmatmul.msk.f32.vlgmr.msra.gmra.mxu3 %vm196_vm3, %v169_v48 }
  0xae   :  { %311 = vmatmul.msk.f32.gmra.mxu3 %vm196_vm3, %v170_v50 }
  0xb6   :  { %312 = vmatmul.msk.f32.gmra.mxu3 %vm196_vm3, %v171_v51 }
 0x129   :  { %v229_v54 = vpop.f32.mrf.mxu3  ;;  %v226_v56 = vpop.f32.mrf.mxu2 }
 0x12a   :  { %v227_v58 = vadd.f32 %v226_v56, %v179_v52  ;;  %v230_v59 = vadd.f32 %v229_v54, %v184_v53 }
 0x12c   :  { %v238_v63 = vmax.f32 %v227_v58, 0.0  ;;  %v239_v0 = vmax.f32 %v230_v59, 0.0 }
 0x12e   :  { %v266_v3 = vmul.f32 %v249_v62, %v238_v63  ;;  %v267_v4 = vmul.f32 %v254_v2, %v239_v0 }
 0x130   :  { %v270_v9 = vadd.f32 %v267_v4, %v266_v3 }
 0x131   :  { %v232_v60 = vpop.f32.mrf.mxu3 }
 0x132   :  { %v233_v61 = vadd.f32 %v232_v60, %v189_v55 }
 0x134   :  { %v240_v1 = vmax.f32 %v233_v61, 0.0 }
 0x136   :  { %v268_v7 = vmul.f32 %v259_v5, %v240_v1 }
 0x138   :  { %v271_v12 = vadd.f32 %v270_v9, %v268_v7 }
 0x139   :  { %v235_v6 = vpop.f32.mrf.mxu3 }
 0x13a   :  { %v236_v8 = vadd.f32 %v235_v6, %v194_v57 }
 0x13c   :  { %v241_v10 = vmax.f32 %v236_v8, 0.0 }
 0x13e   :  { %v269_v13 = vmul.f32 %v264_v11, %v241_v10 }
 0x140   :  { %v272_v14 = vadd.f32 %v271_v12, %v269_v13 }
 0x142   :  { %v273_v15 = vrot.slane %v272_v14, 4 }
 0x144   :  { %v274_v16 = vadd.f32 %v273_v15, %v272_v14 }
 0x146   :  { %v275_v17 = vrot.slane %v274_v16, 2 }
 0x148   :  { %v276_v18 = vadd.f32 %v275_v17, %v274_v16 }
 0x14a   :  { %v277_v19 = vrot.slane %v276_v18, 1 }
 0x14c   :  { %v278_v21 = vadd.f32 %v277_v19, %v276_v18 }
 0x14e   :  { %v281_v22 = vadd.f32 %v280_v20, %v278_v21 }
 0x150   :  { %282 = vst [vmem:[#allocation3] sm:$0x1] %v281_v22 }
 0x151   :  { %293 = dma.vmem_to_hbm [thread:$0]  %s289_s14, 16, %s291_s4, [#allocation4]  }
 0x152   :  { %348 = dma.done.wait [#allocation4], 16  }
 0x153   :  { %349 = vsyncadd [#allocation4], 4294967280 }
 0x154   :  { %298 = vsyncpa [#allocation4], 1 }

</bundles_post_ra>
